<compile_context>
chip_gen: v7x
topology: tpu7x:2x2x1
jax: 0.10.0
libtpu: 0.0.40
codegen_flags: <defaults>
</compile_context>

<pallas_src>
import functools

import jax
import jax.numpy as jnp
from jax import lax
from jax.experimental import pallas as pl
from jax.experimental.pallas import tpu as pltpu


def _sepconv_kernel(x_ref, wdw_ref, wpw_ref, bpw_ref, o_ref, *,
                    h, w, kh, kw, stride, padding, h_out, w_out, sf, eps,
                    hw_pad, use_bf16_matmul):
    # x_ref:   (B, C_in, H*W)       flat, lane-dense input block
    # wdw_ref: (kh*kw, C_mid, 1)    depthwise weights, tap-major, channel-on-sublane
    #                               (blocked replica order when sf > 1)
    # wpw_ref: (C_out, C_mid)       1x1 pointwise weights (columns permuted to match)
    # bpw_ref: (C_out, 1)           pointwise bias
    # o_ref:   (B, C_out, HW_PAD)   lane-dense output block, HW_PAD = roundup(hw_out, 128)
    b_blk, c_in, hw_in = x_ref.shape
    c_mid = c_in * sf
    c_out = o_ref.shape[1]
    hw_out = h_out * w_out

    xf = x_ref[...].astype(jnp.float32)                       # (B, C_in, H*W)

    # Flat-position iota for boundary masks (only needed when padding > 0).
    if padding > 0:
        pos = lax.broadcasted_iota(jnp.int32, (1, 1, hw_in), 2)
        if (w & (w - 1)) == 0:                                # power-of-two width
            col = jnp.bitwise_and(pos, w - 1)
        else:
            col = pos % w

    # ---- depthwise conv: each tap is a single lane-roll of the flat input ----
    # acc[b, c, r*W + cc] = sum_{i,j} w[c,i,j] * x[b, c, r+i-pad, cc+j-pad]
    # with out-of-range source pixels masked to zero (== zero padding).
    accs = [jnp.zeros((b_blk, c_in, hw_in), jnp.float32) for _ in range(sf)]
    for i in range(kh):
        di = i - padding
        for j in range(kw):
            dj = j - padding
            off = di * w + dj
            t = i * kw + j
            if off == 0:
                tap = xf
            else:
                tap = pltpu.roll(xf, shift=(-off) % hw_in, axis=2)
            if padding > 0 and (di != 0 or dj != 0):
                conds = []
                if di < 0:
                    conds.append(pos >= (-di) * w)            # row + di >= 0
                elif di > 0:
                    conds.append(pos < (h - di) * w)          # row + di <  H
                if dj < 0:
                    conds.append(col >= -dj)                  # col + dj >= 0
                elif dj > 0:
                    conds.append(col < w - dj)                # col + dj <  W
                valid = conds[0]
                for cnd in conds[1:]:
                    valid = jnp.logical_and(valid, cnd)
                tap = jnp.where(valid, tap, 0.0)
            w_t = wdw_ref[t].astype(jnp.float32)              # (C_mid, 1) sublane vector
            for r in range(sf):
                w_tr = w_t if sf == 1 else w_t[r * c_in:(r + 1) * c_in]
                accs[r] = accs[r] + tap * w_tr[None, :, :]
    acc = accs[0] if sf == 1 else jnp.concatenate(accs, axis=1)    # (B, C_mid, H*W)

    # NOTE: the depthwise bias is intentionally NOT added: a per-channel constant
    # is exactly removed by InstanceNorm's mean subtraction (variance unchanged).

    # ---- compact to the (B, C_mid, hw_out) output grid (no-op for "same" conv) ----
    if stride == 1 and h_out == h and w_out == w:
        dwo = acc
    elif stride == 1:
        if w_out == w:
            dwo = acc[:, :, :h_out * w]
        else:
            rows = [acc[:, :, oh * w: oh * w + w_out] for oh in range(h_out)]
            dwo = jnp.concatenate(rows, axis=-1)
    else:
        # TODO(synk): strided lane slices may lower slowly; stride>1 is off the hot path here.
        rows = [lax.slice(acc, (0, 0, oh * stride * w),
                          (b_blk, c_mid, oh * stride * w + (w_out - 1) * stride + 1),
                          (1, 1, stride)) for oh in range(h_out)]
        dwo = jnp.concatenate(rows, axis=-1)

    # ---- InstanceNorm2d(affine=False): fused one-pass statistics ----
    mean = jnp.mean(dwo, axis=-1, keepdims=True)              # (B, C_mid, 1)
    msq = jnp.mean(dwo * dwo, axis=-1, keepdims=True)
    var = jnp.maximum(msq - mean * mean, 0.0)
    y = (dwo - mean) * lax.rsqrt(var + eps)                   # (B, C_mid, hw_out)

    # ---- 1x1 pointwise conv ----
    wpw = wpw_ref[...].astype(jnp.float32)                    # (C_out, C_mid)
    bpw = bpw_ref[...].astype(jnp.float32)                    # (C_out, 1)
    if c_mid <= 8:
        # Tiny contraction: C_mid broadcast FMAs on the VPU (MXU is pure overhead here).
        out = jnp.zeros((b_blk, c_out, hw_out), jnp.float32)
        for cm in range(c_mid):
            out = out + y[:, cm:cm + 1, :] * wpw[:, cm:cm + 1][None, :, :]
    else:
        # One batched MXU contraction (bf16 operands, f32 accumulation).
        lhs = wpw.astype(jnp.bfloat16) if use_bf16_matmul else wpw
        rhs = y.astype(jnp.bfloat16) if use_bf16_matmul else y
        out = jnp.einsum('oc,bcp->bop', lhs, rhs,
                         preferred_element_type=jnp.float32)
    out = out + bpw[None, :, :]

    if hw_pad != hw_out:                                      # keep stores lane-dense
        out = jnp.pad(out, ((0, 0), (0, 0), (0, hw_pad - hw_out)))
    o_ref[...] = out.astype(o_ref.dtype)


def separable_conv2d(x, w_dw, b_dw, w_pw, b_pw, *, stride=1, padding=0,
                     scale_factor=1, eps=1e-5, batch_block=None,
                     use_bf16_matmul=True):
    """x: (N, C_in, H, W); w_dw: (C_in*sf, kh, kw) (PyTorch (C_mid,1,kh,kw) squeezed);
    b_dw: (C_in*sf,) (accepted for API parity, cancelled by InstanceNorm);
    w_pw: (C_out, C_in*sf); b_pw: (C_out,)."""
    n, c_in, h, w = x.shape
    c_mid, kh, kw = w_dw.shape
    c_out = w_pw.shape[0]
    assert c_mid == c_in * scale_factor
    # Flat-roll depthwise formulation assumes padding < kernel_size / 2
    # (true for every "same"/valid conv this module is used with).
    assert 2 * padding < kh and 2 * padding < kw

    hp, wp = h + 2 * padding, w + 2 * padding
    h_out = (hp - kh) // stride + 1
    w_out = (wp - kw) // stride + 1
    hw_in = h * w
    hw_out = h_out * w_out
    hw_pad = ((hw_out + 127) // 128) * 128

    # scale_factor>1: permute channels from PyTorch's interleaved order (c*sf + r)
    # to blocked order (r*C_in + c); the matching column permutation of w_pw keeps
    # the composed op identical, and the kernel never has to interleave channels.
    if scale_factor > 1:
        perm = [c * scale_factor + r for r in range(scale_factor) for c in range(c_in)]
        perm = jnp.asarray(perm, dtype=jnp.int32)
        w_dw_b = w_dw[perm]
        w_pw_b = w_pw[:, perm]
    else:
        w_dw_b, w_pw_b = w_dw, w_pw

    # Depthwise weights tap-major with channels on the sublane axis: (kh*kw, C_mid, 1).
    w_dw_t = jnp.transpose(w_dw_b.reshape(c_mid, kh * kw), (1, 0)).reshape(kh * kw, c_mid, 1)
    b_pw_c = b_pw.reshape(c_out, 1)
    # b_dw is not passed to the kernel: a per-channel constant is exactly cancelled
    # by InstanceNorm2d(affine=False)'s mean subtraction.

    x_flat = x.reshape(n, c_in, hw_in)            # metadata-only on contiguous NCHW

    # ---- per-generation VMEM budget and batch blocking ----
    try:
        vmem_cap = int(pltpu.get_tpu_info().vmem_capacity_bytes)  # 64 MiB v7x, 128 MiB v5e/v6e
    except Exception:
        vmem_cap = 64 * 1024 * 1024
    vmem_budget = int(min(vmem_cap * 3 // 4, 100 * 1024 * 1024))

    itemsize = jnp.dtype(x.dtype).itemsize
    per_sample = (2 * c_in * hw_in * itemsize        # double-buffered input tile
                  + 2 * c_out * hw_pad * itemsize    # double-buffered output tile
                  + (2 * c_in + c_mid) * hw_in * 4   # xf + rolled tap + depthwise acc
                  + (c_mid + c_out) * hw_pad * 4)    # normalized y + pointwise out
    per_sample = int(per_sample) * 2                 # headroom for compiler temps/spills

    if batch_block is None:
        max_by_vmem = max(1, vmem_budget // per_sample)
        target_steps = min(n, 4)                     # >= 4 steps keeps the DMA pipeline full
        max_by_steps = max(1, n // target_steps)
        cap = int(max(1, min(max_by_vmem, max_by_steps, n)))
        batch_block = 1
        for d in range(1, cap + 1):                  # largest divisor of n that fits
            if n % d == 0:
                batch_block = d
    assert n % batch_block == 0
    num_steps = n // batch_block

    kernel = functools.partial(
        _sepconv_kernel, h=h, w=w, kh=kh, kw=kw, stride=stride, padding=padding,
        h_out=h_out, w_out=w_out, sf=scale_factor, eps=eps, hw_pad=hw_pad,
        use_bf16_matmul=use_bf16_matmul)

    out_flat = pl.pallas_call(
        kernel,
        out_shape=jax.ShapeDtypeStruct((n, c_out, hw_pad), x.dtype),
        grid_spec=pltpu.PrefetchScalarGridSpec(
            num_scalar_prefetch=0,
            grid=(num_steps,),
            in_specs=[
                pl.BlockSpec((batch_block, c_in, hw_in), lambda i: (i, 0, 0)),
                pl.BlockSpec((kh * kw, c_mid, 1), lambda i: (0, 0, 0)),
                pl.BlockSpec((c_out, c_mid), lambda i: (0, 0)),
                pl.BlockSpec((c_out, 1), lambda i: (0, 0)),
            ],
            out_specs=pl.BlockSpec((batch_block, c_out, hw_pad),
                                   lambda i: (i, 0, 0)),
        ),
        compiler_params=pltpu.CompilerParams(
            dimension_semantics=("parallel",),
            vmem_limit_bytes=vmem_budget),
    )(x_flat, w_dw_t, w_pw_b, b_pw_c)

    if hw_pad != hw_out:
        out_flat = out_flat[:, :, :hw_out]
    # (N, C_out, H_out*W_out) -> (N, C_out, H_out, W_out): metadata-only reshape.
    return out_flat.reshape(n, c_out, h_out, w_out)


def _reference(x, w_dw, b_dw, w_pw, b_pw, *, stride, padding, eps):
    """Pure-JAX reference matching PyTorch semantics."""
    c_in = x.shape[1]
    c_mid = w_dw.shape[0]
    dw = lax.conv_general_dilated(
        x, w_dw[:, None, :, :], window_strides=(stride, stride),
        padding=[(padding, padding), (padding, padding)],
        dimension_numbers=('NCHW', 'OIHW', 'NCHW'),
        feature_group_count=c_in)
    dw = dw + b_dw.reshape(1, c_mid, 1, 1)
    mean = dw.mean(axis=(2, 3), keepdims=True)
    var = ((dw - mean) ** 2).mean(axis=(2, 3), keepdims=True)
    y = (dw - mean) / jnp.sqrt(var + eps)
    pw = lax.conv_general_dilated(
        y, w_pw[:, :, None, None], window_strides=(1, 1), padding='VALID',
        dimension_numbers=('NCHW', 'OIHW', 'NCHW'))
    return pw + b_pw.reshape(1, -1, 1, 1)


if __name__ == "__main__":
    # Module config: SeparableConv2d(in_channels=4, out_channels=8,
    #                                kernel_size=3, stride=1, padding=1,
    #                                scale_factor=1)
    N, C_IN, H, W = 2, 4, 16, 16
    C_OUT, K, STRIDE, PAD, SF = 8, 3, 1, 1, 1
    C_MID = C_IN * SF

    key = jax.random.PRNGKey(0)
    kx, k1, k2, k3, k4 = jax.random.split(key, 5)
    x = jax.random.normal(kx, (N, C_IN, H, W), jnp.float32)
    # Depthwise weight in PyTorch is (C_mid, 1, K, K); kept squeezed.
    w_dw = jax.random.normal(k1, (C_MID, K, K), jnp.float32) * 0.2
    b_dw = jax.random.normal(k2, (C_MID,), jnp.float32) * 0.1
    # Pointwise weight in PyTorch is (C_out, C_mid, 1, 1); kept squeezed.
    w_pw = jax.random.normal(k3, (C_OUT, C_MID), jnp.float32) * 0.2
    b_pw = jax.random.normal(k4, (C_OUT,), jnp.float32) * 0.1

    out = separable_conv2d(x, w_dw, b_dw, w_pw, b_pw,
                           stride=STRIDE, padding=PAD, scale_factor=SF)
    out = jax.block_until_ready(out)

    ref = _reference(x, w_dw, b_dw, w_pw, b_pw,
                     stride=STRIDE, padding=PAD, eps=1e-5)
    assert out.shape == (N, C_OUT, H, W)
    err = jnp.max(jnp.abs(out - ref))
    assert jnp.allclose(out, ref, atol=1e-4, rtol=1e-4), f"max abs err {err}"
    print("KERNEL_OK")
</pallas_src>

<mosaic_0001>
module attributes {stable_mosaic.version = 11 : i64} {
  func.func @_sepconv_kernel(%arg0: i32, %arg1: memref<1x4x256xf32, #tpu.memory_space<vmem>>, %arg2: memref<9x4x1xf32, #tpu.memory_space<vmem>>, %arg3: memref<8x4xf32, #tpu.memory_space<vmem>>, %arg4: memref<8x1xf32, #tpu.memory_space<vmem>>, %arg5: memref<1x8x256xf32, #tpu.memory_space<vmem>>) attributes {dimension_semantics = [#tpu.dimension_semantics<parallel>], iteration_bounds = array<i64: 2>, scalar_prefetch = 0 : i64, scratch_operands = 0 : i64, tpu.core_type = #tpu.core_type<tc>, window_params = [{transform_indices = @transform_0, window_bounds = array<i64: 1, 4, 256>}, {pipeline_mode = #tpu.pipeline_mode<synchronous>, transform_indices = @transform_1, window_bounds = array<i64: 9, 4, 1>}, {pipeline_mode = #tpu.pipeline_mode<synchronous>, transform_indices = @transform_2, window_bounds = array<i64: 8, 4>}, {pipeline_mode = #tpu.pipeline_mode<synchronous>, transform_indices = @transform_3, window_bounds = array<i64: 8, 1>}, {transform_indices = @transform_4, window_bounds = array<i64: 1, 8, 256>}]} {
    %c0 = arith.constant 0 : index
    %c0_0 = arith.constant 0 : index
    %c0_1 = arith.constant 0 : index
    %0 = vector.load %arg1[%c0, %c0_0, %c0_1] : memref<1x4x256xf32, #tpu.memory_space<vmem>>, vector<1x4x256xf32>
    %1 = tpu.iota {dimensions = array<i32: 2>} : vector<1x1x256xi32>
    %c15_i32 = arith.constant 15 : i32
    %2 = vector.broadcast %c15_i32 : i32 to vector<1x1x256xi32>
    %3 = arith.andi %1, %2 : vector<1x1x256xi32>
    %cst = arith.constant 0.000000e+00 : f32
    %4 = vector.broadcast %cst : f32 to vector<1x4x256xf32>
    %c17_i32 = arith.constant 17 : i32
    %5 = tpu.dynamic_rotate %0 by %c17_i32 dim 2 : vector<1x4x256xf32>, i32 -> vector<1x4x256xf32>
    %c16_i32 = arith.constant 16 : i32
    %6 = vector.broadcast %c16_i32 : i32 to vector<1x1x256xi32>
    %7 = arith.cmpi sge, %1, %6 : vector<1x1x256xi32>
    %c1_i32 = arith.constant 1 : i32
    %8 = vector.broadcast %c1_i32 : i32 to vector<1x1x256xi32>
    %9 = arith.cmpi sge, %3, %8 : vector<1x1x256xi32>
    %10 = arith.andi %7, %9 : vector<1x1x256xi1>
    %cst_2 = arith.constant 0.000000e+00 : f32
    %11 = vector.shape_cast %10 : vector<1x1x256xi1> to vector<1x1x256xi1>
    %12 = vector.broadcast %11 : vector<1x1x256xi1> to vector<1x4x256xi1>
    %13 = vector.broadcast %cst_2 : f32 to vector<1x4x256xf32>
    %14 = arith.select %12, %5, %13 : vector<1x4x256xi1>, vector<1x4x256xf32>
    %c0_3 = arith.constant 0 : index
    %c0_4 = arith.constant 0 : index
    %c0_5 = arith.constant 0 : index
    %15 = vector.load %arg2[%c0_3, %c0_4, %c0_5] : memref<9x4x1xf32, #tpu.memory_space<vmem>>, vector<1x4x1xf32>
    %16 = vector.shape_cast %15 : vector<1x4x1xf32> to vector<4x1xf32>
    %17 = vector.shape_cast %16 : vector<4x1xf32> to vector<1x4x1xf32>
    %18 = vector.broadcast %17 : vector<1x4x1xf32> to vector<1x4x256xf32>
    %19 = arith.mulf %14, %18 : vector<1x4x256xf32>
    %20 = arith.addf %4, %19 : vector<1x4x256xf32>
    %c16_i32_6 = arith.constant 16 : i32
    %21 = tpu.dynamic_rotate %0 by %c16_i32_6 dim 2 : vector<1x4x256xf32>, i32 -> vector<1x4x256xf32>
    %c16_i32_7 = arith.constant 16 : i32
    %22 = vector.broadcast %c16_i32_7 : i32 to vector<1x1x256xi32>
    %23 = arith.cmpi sge, %1, %22 : vector<1x1x256xi32>
    %cst_8 = arith.constant 0.000000e+00 : f32
    %24 = vector.shape_cast %23 : vector<1x1x256xi1> to vector<1x1x256xi1>
    %25 = vector.broadcast %24 : vector<1x1x256xi1> to vector<1x4x256xi1>
    %26 = vector.broadcast %cst_8 : f32 to vector<1x4x256xf32>
    %27 = arith.select %25, %21, %26 : vector<1x4x256xi1>, vector<1x4x256xf32>
    %c1 = arith.constant 1 : index
    %c0_9 = arith.constant 0 : index
    %c0_10 = arith.constant 0 : index
    %28 = vector.load %arg2[%c1, %c0_9, %c0_10] : memref<9x4x1xf32, #tpu.memory_space<vmem>>, vector<1x4x1xf32>
    %29 = vector.shape_cast %28 : vector<1x4x1xf32> to vector<4x1xf32>
    %30 = vector.shape_cast %29 : vector<4x1xf32> to vector<1x4x1xf32>
    %31 = vector.broadcast %30 : vector<1x4x1xf32> to vector<1x4x256xf32>
    %32 = arith.mulf %27, %31 : vector<1x4x256xf32>
    %33 = arith.addf %20, %32 : vector<1x4x256xf32>
    %c15_i32_11 = arith.constant 15 : i32
    %34 = tpu.dynamic_rotate %0 by %c15_i32_11 dim 2 : vector<1x4x256xf32>, i32 -> vector<1x4x256xf32>
    %c16_i32_12 = arith.constant 16 : i32
    %35 = vector.broadcast %c16_i32_12 : i32 to vector<1x1x256xi32>
    %36 = arith.cmpi sge, %1, %35 : vector<1x1x256xi32>
    %c15_i32_13 = arith.constant 15 : i32
    %37 = vector.broadcast %c15_i32_13 : i32 to vector<1x1x256xi32>
    %38 = arith.cmpi slt, %3, %37 : vector<1x1x256xi32>
    %39 = arith.andi %36, %38 : vector<1x1x256xi1>
    %cst_14 = arith.constant 0.000000e+00 : f32
    %40 = vector.shape_cast %39 : vector<1x1x256xi1> to vector<1x1x256xi1>
    %41 = vector.broadcast %40 : vector<1x1x256xi1> to vector<1x4x256xi1>
    %42 = vector.broadcast %cst_14 : f32 to vector<1x4x256xf32>
    %43 = arith.select %41, %34, %42 : vector<1x4x256xi1>, vector<1x4x256xf32>
    %c2 = arith.constant 2 : index
    %c0_15 = arith.constant 0 : index
    %c0_16 = arith.constant 0 : index
    %44 = vector.load %arg2[%c2, %c0_15, %c0_16] : memref<9x4x1xf32, #tpu.memory_space<vmem>>, vector<1x4x1xf32>
    %45 = vector.shape_cast %44 : vector<1x4x1xf32> to vector<4x1xf32>
    %46 = vector.shape_cast %45 : vector<4x1xf32> to vector<1x4x1xf32>
    %47 = vector.broadcast %46 : vector<1x4x1xf32> to vector<1x4x256xf32>
    %48 = arith.mulf %43, %47 : vector<1x4x256xf32>
    %49 = arith.addf %33, %48 : vector<1x4x256xf32>
    %c1_i32_17 = arith.constant 1 : i32
    %50 = tpu.dynamic_rotate %0 by %c1_i32_17 dim 2 : vector<1x4x256xf32>, i32 -> vector<1x4x256xf32>
    %c1_i32_18 = arith.constant 1 : i32
    %51 = vector.broadcast %c1_i32_18 : i32 to vector<1x1x256xi32>
    %52 = arith.cmpi sge, %3, %51 : vector<1x1x256xi32>
    %cst_19 = arith.constant 0.000000e+00 : f32
    %53 = vector.shape_cast %52 : vector<1x1x256xi1> to vector<1x1x256xi1>
    %54 = vector.broadcast %53 : vector<1x1x256xi1> to vector<1x4x256xi1>
    %55 = vector.broadcast %cst_19 : f32 to vector<1x4x256xf32>
    %56 = arith.select %54, %50, %55 : vector<1x4x256xi1>, vector<1x4x256xf32>
    %c3 = arith.constant 3 : index
    %c0_20 = arith.constant 0 : index
    %c0_21 = arith.constant 0 : index
    %57 = vector.load %arg2[%c3, %c0_20, %c0_21] : memref<9x4x1xf32, #tpu.memory_space<vmem>>, vector<1x4x1xf32>
    %58 = vector.shape_cast %57 : vector<1x4x1xf32> to vector<4x1xf32>
    %59 = vector.shape_cast %58 : vector<4x1xf32> to vector<1x4x1xf32>
    %60 = vector.broadcast %59 : vector<1x4x1xf32> to vector<1x4x256xf32>
    %61 = arith.mulf %56, %60 : vector<1x4x256xf32>
    %62 = arith.addf %49, %61 : vector<1x4x256xf32>
    %c4 = arith.constant 4 : index
    %c0_22 = arith.constant 0 : index
    %c0_23 = arith.constant 0 : index
    %63 = vector.load %arg2[%c4, %c0_22, %c0_23] : memref<9x4x1xf32, #tpu.memory_space<vmem>>, vector<1x4x1xf32>
    %64 = vector.shape_cast %63 : vector<1x4x1xf32> to vector<4x1xf32>
    %65 = vector.shape_cast %64 : vector<4x1xf32> to vector<1x4x1xf32>
    %66 = vector.broadcast %65 : vector<1x4x1xf32> to vector<1x4x256xf32>
    %67 = arith.mulf %0, %66 : vector<1x4x256xf32>
    %68 = arith.addf %62, %67 : vector<1x4x256xf32>
    %c255_i32 = arith.constant 255 : i32
    %69 = tpu.dynamic_rotate %0 by %c255_i32 dim 2 : vector<1x4x256xf32>, i32 -> vector<1x4x256xf32>
    %c15_i32_24 = arith.constant 15 : i32
    %70 = vector.broadcast %c15_i32_24 : i32 to vector<1x1x256xi32>
    %71 = arith.cmpi slt, %3, %70 : vector<1x1x256xi32>
    %cst_25 = arith.constant 0.000000e+00 : f32
    %72 = vector.shape_cast %71 : vector<1x1x256xi1> to vector<1x1x256xi1>
    %73 = vector.broadcast %72 : vector<1x1x256xi1> to vector<1x4x256xi1>
    %74 = vector.broadcast %cst_25 : f32 to vector<1x4x256xf32>
    %75 = arith.select %73, %69, %74 : vector<1x4x256xi1>, vector<1x4x256xf32>
    %c5 = arith.constant 5 : index
    %c0_26 = arith.constant 0 : index
    %c0_27 = arith.constant 0 : index
    %76 = vector.load %arg2[%c5, %c0_26, %c0_27] : memref<9x4x1xf32, #tpu.memory_space<vmem>>, vector<1x4x1xf32>
    %77 = vector.shape_cast %76 : vector<1x4x1xf32> to vector<4x1xf32>
    %78 = vector.shape_cast %77 : vector<4x1xf32> to vector<1x4x1xf32>
    %79 = vector.broadcast %78 : vector<1x4x1xf32> to vector<1x4x256xf32>
    %80 = arith.mulf %75, %79 : vector<1x4x256xf32>
    %81 = arith.addf %68, %80 : vector<1x4x256xf32>
    %c241_i32 = arith.constant 241 : i32
    %82 = tpu.dynamic_rotate %0 by %c241_i32 dim 2 : vector<1x4x256xf32>, i32 -> vector<1x4x256xf32>
    %c240_i32 = arith.constant 240 : i32
    %83 = vector.broadcast %c240_i32 : i32 to vector<1x1x256xi32>
    %84 = arith.cmpi slt, %1, %83 : vector<1x1x256xi32>
    %c1_i32_28 = arith.constant 1 : i32
    %85 = vector.broadcast %c1_i32_28 : i32 to vector<1x1x256xi32>
    %86 = arith.cmpi sge, %3, %85 : vector<1x1x256xi32>
    %87 = arith.andi %84, %86 : vector<1x1x256xi1>
    %cst_29 = arith.constant 0.000000e+00 : f32
    %88 = vector.shape_cast %87 : vector<1x1x256xi1> to vector<1x1x256xi1>
    %89 = vector.broadcast %88 : vector<1x1x256xi1> to vector<1x4x256xi1>
    %90 = vector.broadcast %cst_29 : f32 to vector<1x4x256xf32>
    %91 = arith.select %89, %82, %90 : vector<1x4x256xi1>, vector<1x4x256xf32>
    %c6 = arith.constant 6 : index
    %c0_30 = arith.constant 0 : index
    %c0_31 = arith.constant 0 : index
    %92 = vector.load %arg2[%c6, %c0_30, %c0_31] : memref<9x4x1xf32, #tpu.memory_space<vmem>>, vector<1x4x1xf32>
    %93 = vector.shape_cast %92 : vector<1x4x1xf32> to vector<4x1xf32>
    %94 = vector.shape_cast %93 : vector<4x1xf32> to vector<1x4x1xf32>
    %95 = vector.broadcast %94 : vector<1x4x1xf32> to vector<1x4x256xf32>
    %96 = arith.mulf %91, %95 : vector<1x4x256xf32>
    %97 = arith.addf %81, %96 : vector<1x4x256xf32>
    %c240_i32_32 = arith.constant 240 : i32
    %98 = tpu.dynamic_rotate %0 by %c240_i32_32 dim 2 : vector<1x4x256xf32>, i32 -> vector<1x4x256xf32>
    %c240_i32_33 = arith.constant 240 : i32
    %99 = vector.broadcast %c240_i32_33 : i32 to vector<1x1x256xi32>
    %100 = arith.cmpi slt, %1, %99 : vector<1x1x256xi32>
    %cst_34 = arith.constant 0.000000e+00 : f32
    %101 = vector.shape_cast %100 : vector<1x1x256xi1> to vector<1x1x256xi1>
    %102 = vector.broadcast %101 : vector<1x1x256xi1> to vector<1x4x256xi1>
    %103 = vector.broadcast %cst_34 : f32 to vector<1x4x256xf32>
    %104 = arith.select %102, %98, %103 : vector<1x4x256xi1>, vector<1x4x256xf32>
    %c7 = arith.constant 7 : index
    %c0_35 = arith.constant 0 : index
    %c0_36 = arith.constant 0 : index
    %105 = vector.load %arg2[%c7, %c0_35, %c0_36] : memref<9x4x1xf32, #tpu.memory_space<vmem>>, vector<1x4x1xf32>
    %106 = vector.shape_cast %105 : vector<1x4x1xf32> to vector<4x1xf32>
    %107 = vector.shape_cast %106 : vector<4x1xf32> to vector<1x4x1xf32>
    %108 = vector.broadcast %107 : vector<1x4x1xf32> to vector<1x4x256xf32>
    %109 = arith.mulf %104, %108 : vector<1x4x256xf32>
    %110 = arith.addf %97, %109 : vector<1x4x256xf32>
    %c239_i32 = arith.constant 239 : i32
    %111 = tpu.dynamic_rotate %0 by %c239_i32 dim 2 : vector<1x4x256xf32>, i32 -> vector<1x4x256xf32>
    %c240_i32_37 = arith.constant 240 : i32
    %112 = vector.broadcast %c240_i32_37 : i32 to vector<1x1x256xi32>
    %113 = arith.cmpi slt, %1, %112 : vector<1x1x256xi32>
    %c15_i32_38 = arith.constant 15 : i32
    %114 = vector.broadcast %c15_i32_38 : i32 to vector<1x1x256xi32>
    %115 = arith.cmpi slt, %3, %114 : vector<1x1x256xi32>
    %116 = arith.andi %113, %115 : vector<1x1x256xi1>
    %cst_39 = arith.constant 0.000000e+00 : f32
    %117 = vector.shape_cast %116 : vector<1x1x256xi1> to vector<1x1x256xi1>
    %118 = vector.broadcast %117 : vector<1x1x256xi1> to vector<1x4x256xi1>
    %119 = vector.broadcast %cst_39 : f32 to vector<1x4x256xf32>
    %120 = arith.select %118, %111, %119 : vector<1x4x256xi1>, vector<1x4x256xf32>
    %c8 = arith.constant 8 : index
    %c0_40 = arith.constant 0 : index
    %c0_41 = arith.constant 0 : index
    %121 = vector.load %arg2[%c8, %c0_40, %c0_41] : memref<9x4x1xf32, #tpu.memory_space<vmem>>, vector<1x4x1xf32>
    %122 = vector.shape_cast %121 : vector<1x4x1xf32> to vector<4x1xf32>
    %123 = vector.shape_cast %122 : vector<4x1xf32> to vector<1x4x1xf32>
    %124 = vector.broadcast %123 : vector<1x4x1xf32> to vector<1x4x256xf32>
    %125 = arith.mulf %120, %124 : vector<1x4x256xf32>
    %126 = arith.addf %110, %125 : vector<1x4x256xf32>
    %cst_42 = arith.constant dense<0.000000e+00> : vector<1x4xf32>
    %127 = vector.multi_reduction <add>, %126, %cst_42 [2] : vector<1x4x256xf32> to vector<1x4xf32>
    %128 = vector.shape_cast %127 : vector<1x4xf32> to vector<1x4x1xf32>
    %cst_43 = arith.constant 2.560000e+02 : f32
    %129 = vector.broadcast %cst_43 : f32 to vector<1x4x1xf32>
    %130 = arith.divf %128, %129 : vector<1x4x1xf32>
    %131 = arith.mulf %126, %126 : vector<1x4x256xf32>
    %cst_44 = arith.constant dense<0.000000e+00> : vector<1x4xf32>
    %132 = vector.multi_reduction <add>, %131, %cst_44 [2] : vector<1x4x256xf32> to vector<1x4xf32>
    %133 = vector.shape_cast %132 : vector<1x4xf32> to vector<1x4x1xf32>
    %cst_45 = arith.constant 2.560000e+02 : f32
    %134 = vector.broadcast %cst_45 : f32 to vector<1x4x1xf32>
    %135 = arith.divf %133, %134 : vector<1x4x1xf32>
    %136 = arith.mulf %130, %130 : vector<1x4x1xf32>
    %137 = arith.subf %135, %136 : vector<1x4x1xf32>
    %cst_46 = arith.constant 0.000000e+00 : f32
    %138 = vector.broadcast %cst_46 : f32 to vector<1x4x1xf32>
    %139 = arith.maximumf %137, %138 : vector<1x4x1xf32>
    %140 = vector.broadcast %130 : vector<1x4x1xf32> to vector<1x4x256xf32>
    %141 = arith.subf %126, %140 : vector<1x4x256xf32>
    %cst_47 = arith.constant 9.99999974E-6 : f32
    %142 = vector.broadcast %cst_47 : f32 to vector<1x4x1xf32>
    %143 = arith.addf %139, %142 : vector<1x4x1xf32>
    %144 = math.rsqrt %143 : vector<1x4x1xf32>
    %145 = vector.broadcast %144 : vector<1x4x1xf32> to vector<1x4x256xf32>
    %146 = arith.mulf %141, %145 : vector<1x4x256xf32>
    %c0_48 = arith.constant 0 : index
    %c0_49 = arith.constant 0 : index
    %147 = vector.load %arg3[%c0_48, %c0_49] : memref<8x4xf32, #tpu.memory_space<vmem>>, vector<8x4xf32>
    %c0_50 = arith.constant 0 : index
    %c0_51 = arith.constant 0 : index
    %148 = vector.load %arg4[%c0_50, %c0_51] : memref<8x1xf32, #tpu.memory_space<vmem>>, vector<8x1xf32>
    %cst_52 = arith.constant 0.000000e+00 : f32
    %149 = vector.broadcast %cst_52 : f32 to vector<1x8x256xf32>
    %150 = vector.extract_strided_slice %146 {offsets = [0, 0, 0], sizes = [1, 1, 256], strides = [1, 1, 1]} : vector<1x4x256xf32> to vector<1x1x256xf32>
    %151 = vector.extract_strided_slice %147 {offsets = [0, 0], sizes = [8, 1], strides = [1, 1]} : vector<8x4xf32> to vector<8x1xf32>
    %152 = vector.shape_cast %151 : vector<8x1xf32> to vector<1x8x1xf32>
    %153 = vector.broadcast %150 : vector<1x1x256xf32> to vector<1x8x256xf32>
    %154 = vector.broadcast %152 : vector<1x8x1xf32> to vector<1x8x256xf32>
    %155 = arith.mulf %153, %154 : vector<1x8x256xf32>
    %156 = arith.addf %149, %155 : vector<1x8x256xf32>
    %157 = vector.extract_strided_slice %146 {offsets = [0, 1, 0], sizes = [1, 1, 256], strides = [1, 1, 1]} : vector<1x4x256xf32> to vector<1x1x256xf32>
    %158 = vector.extract_strided_slice %147 {offsets = [0, 1], sizes = [8, 1], strides = [1, 1]} : vector<8x4xf32> to vector<8x1xf32>
    %159 = vector.shape_cast %158 : vector<8x1xf32> to vector<1x8x1xf32>
    %160 = vector.broadcast %157 : vector<1x1x256xf32> to vector<1x8x256xf32>
    %161 = vector.broadcast %159 : vector<1x8x1xf32> to vector<1x8x256xf32>
    %162 = arith.mulf %160, %161 : vector<1x8x256xf32>
    %163 = arith.addf %156, %162 : vector<1x8x256xf32>
    %164 = vector.extract_strided_slice %146 {offsets = [0, 2, 0], sizes = [1, 1, 256], strides = [1, 1, 1]} : vector<1x4x256xf32> to vector<1x1x256xf32>
    %165 = vector.extract_strided_slice %147 {offsets = [0, 2], sizes = [8, 1], strides = [1, 1]} : vector<8x4xf32> to vector<8x1xf32>
    %166 = vector.shape_cast %165 : vector<8x1xf32> to vector<1x8x1xf32>
    %167 = vector.broadcast %164 : vector<1x1x256xf32> to vector<1x8x256xf32>
    %168 = vector.broadcast %166 : vector<1x8x1xf32> to vector<1x8x256xf32>
    %169 = arith.mulf %167, %168 : vector<1x8x256xf32>
    %170 = arith.addf %163, %169 : vector<1x8x256xf32>
    %171 = vector.extract_strided_slice %146 {offsets = [0, 3, 0], sizes = [1, 1, 256], strides = [1, 1, 1]} : vector<1x4x256xf32> to vector<1x1x256xf32>
    %172 = vector.extract_strided_slice %147 {offsets = [0, 3], sizes = [8, 1], strides = [1, 1]} : vector<8x4xf32> to vector<8x1xf32>
    %173 = vector.shape_cast %172 : vector<8x1xf32> to vector<1x8x1xf32>
    %174 = vector.broadcast %171 : vector<1x1x256xf32> to vector<1x8x256xf32>
    %175 = vector.broadcast %173 : vector<1x8x1xf32> to vector<1x8x256xf32>
    %176 = arith.mulf %174, %175 : vector<1x8x256xf32>
    %177 = arith.addf %170, %176 : vector<1x8x256xf32>
    %178 = vector.shape_cast %148 : vector<8x1xf32> to vector<1x8x1xf32>
    %179 = vector.broadcast %178 : vector<1x8x1xf32> to vector<1x8x256xf32>
    %180 = arith.addf %177, %179 : vector<1x8x256xf32>
    %c0_53 = arith.constant 0 : index
    %c0_54 = arith.constant 0 : index
    %c0_55 = arith.constant 0 : index
    %181 = vector.load %arg5[%c0_53, %c0_54, %c0_55] : memref<1x8x256xf32, #tpu.memory_space<vmem>>, vector<1x8x256xf32>
    tpu.vector_store %arg5[%c0_53, %c0_54, %c0_55], %180 {strides = array<i32>} : memref<1x8x256xf32, #tpu.memory_space<vmem>>, vector<1x8x256xf32>,
    return
  }
  func.func @transform_0(%arg0: i32) -> (i32, i32, i32) {
    %c0_i32 = arith.constant 0 : i32
    %c0_i32_0 = arith.constant 0 : i32
    %c0_i32_1 = arith.constant 0 : i32
    return %arg0, %c0_i32, %c0_i32_0 : i32, i32, i32
  }
  func.func @transform_1(%arg0: i32) -> (i32, i32, i32) {
    %c0_i32 = arith.constant 0 : i32
    %c0_i32_0 = arith.constant 0 : i32
    %c0_i32_1 = arith.constant 0 : i32
    %c0_i32_2 = arith.constant 0 : i32
    return %c0_i32, %c0_i32_0, %c0_i32_1 : i32, i32, i32
  }
  func.func @transform_2(%arg0: i32) -> (i32, i32) {
    %c0_i32 = arith.constant 0 : i32
    %c0_i32_0 = arith.constant 0 : i32
    %c0_i32_1 = arith.constant 0 : i32
    return %c0_i32, %c0_i32_0 : i32, i32
  }
  func.func @transform_3(%arg0: i32) -> (i32, i32) {
    %c0_i32 = arith.constant 0 : i32
    %c0_i32_0 = arith.constant 0 : i32
    %c0_i32_1 = arith.constant 0 : i32
    return %c0_i32, %c0_i32_0 : i32, i32
  }
  func.func @transform_4(%arg0: i32) -> (i32, i32, i32) {
    %c0_i32 = arith.constant 0 : i32
    %c0_i32_0 = arith.constant 0 : i32
    %c0_i32_1 = arith.constant 0 : i32
    return %arg0, %c0_i32, %c0_i32_0 : i32, i32, i32
  }
}

</mosaic_0001>

<bundles_post_ra>
// kernel: tpu_custom_call.1
= control target key start
LH: loop header
LB: loop body
LE: loop exit
PB: predicated region body
PF: predicated region fallthrough
CT: control target
= control target key end

     0   :  { %9 = vsyncpa [#allocation3], 0  ;;  %s1069_s0 = inlined_call_operand.vmem [shape: f32[2,4,256], index: 0, kind: input, shape index: {}]   ;;  %s1070_s1 = inlined_call_operand.vmem [shape: f32[9,4,1], index: 1, kind: input, shape index: {}]   ;;  %s1071_s2 = inlined_call_operand.vmem [shape: f32[8,4], index: 2, kind: input, shape index: {}]   ;;  %s1072_s3 = inlined_call_operand.vmem [shape: f32[8,1], index: 3, kind: input, shape index: {}]   ;;  %s1073_s4 = inlined_call_operand.hbm [shape: f32[2,8,256], index: 4, kind: output, shape index: {}]  }
   0x1   :  { %11 = vsyncpa [#allocation3 + $0x1], 0  ;;  %s794_s15 = smov 0   ;;  %s796_s16 = smov 0  }
   0x2   :  { %s798_s17 = smov 0   ;;  %s800_s18 = smov 0  }
   0x3 LB: > { %s815_s19 = sadd.s32 4294967295, %s753_s18   ;;  %s607_s20 = sadd.s32 4294967294, %s753_s18   ;;  %s753_s18 = sphi %s800_s18, %s1093_s18   ;;  %s749_s17 = sphi %s798_s17, %s1092_s17   ;;  %s745_s16 = sphi %s796_s16, %s1091_s16   ;;  %s741_s15 = sphi %s794_s15, %s1090_s15  }
   0x4   : > { %s819_s21 = sadd.s32 1, %s753_s18   ;;  %s113_s22 = sadd.s32 1, %s749_s17 }
   0x5   : > { %s110_s23 = ssub.s32 %s753_s18, %s819_s21  ;;  %p123_p0 = scmp.ne.s32.totalorder %s749_s17, %s745_s16 }
   0x6   : > { %p111_p1 = scmp.eq.s32.totalorder %s110_s23, 0  ;;  %p124_p2 = scmp.eq.s32.totalorder %s815_s19, 1 }
   0x7   : > { %p129_p3 = scmp.ne.s32.totalorder %s745_s16, %s741_s15  ;;  %p130_p4 = scmp.eq.s32.totalorder %s607_s20, 1 }
   0x8   : > { %s830_s24 = scalar_select %p111_p1, %s749_s17, %s113_s22  }
   0x9   : > { %p832_p5 = por %p124_p2, %p123_p0  ;;  %p836_p6 = por %p130_p4, %p129_p3 }
   0xa   : > { %p610_p7 = scmp.ge.s32.totalorder %s753_s18, 1  ;;  %p165_p8 = scmp.lt.s32.totalorder %s753_s18, 3 }
   0xc   : > { %p166_p9 = pnand %p610_p7, %p165_p8 }
   0xd   : > { %v615_v0 = vld [vmem:[%s1070_s1 + $0x8] sm:$0xf] (!%p166_p9)  ;;  %v224_v1 = vld [vmem:[%s1070_s1] sm:$0xf] (!%p166_p9)  ;;  %p191_p10 = scmp.lt.s32.totalorder (!%p166_p9), %s815_s19, 1  ;;  %v755_v2 = vmov (!%p166_p9), 0   ;;  %v197_v21 = vlaneseq (!%p166_p9) }
   0xe   : > { %169 = sbr.rel (%p166_p9) target bundleno = 392 (0x188), region = 36  ;;  %682 = vset.pattern.permute.xlu1 (!%p166_p9), %v755_v2  ;;  %681 = vset.pattern.permute.xlu0 (!%p166_p9), %v755_v2  ;;  %v617_v3 = vld [vmem:[%s1070_s1 + $0x10] sm:$0xf] (!%p166_p9)  ;;  %v614_v4 = vld [vmem:[%s1070_s1 + $0x4] sm:$0xf] (!%p166_p9)  ;;  %s756_s22 = smov (!%p166_p9), 17  }
   0xf   : > { %279 = vperm.xlu1 (!%p166_p9), %682, %v615_v0   ;;  %227 = vperm.xlu0 (!%p166_p9), %681, %v224_v1   ;;  %v616_v5 = vld [vmem:[%s1070_s1 + $0xc] sm:$0xf] (!%p166_p9)  ;;  %s757_s23 = smov (!%p166_p9), 16   ;;  %s758_s27 = smov (!%p166_p9), 15   ;;  %v618_v8 = vld [vmem:[%s1070_s1 + $0x14] sm:$0xf] (!%p166_p9) }
  0x10   : > { %s759_s30 = smov (!%p166_p9), 1   ;;  %v620_v9 = vld [vmem:[%s1070_s1 + $0x1c] sm:$0xf] (!%p166_p9)  ;;  %v619_v10 = vld [vmem:[%s1070_s1 + $0x18] sm:$0xf] (!%p166_p9)  ;;  %s760_s9 = smov (!%p166_p9), 127  }
  0x11   : > { %v621_v11 = vld [vmem:[%s1070_s1 + $0x20] sm:$0xf] (!%p166_p9)  ;;  %s761_s12 = smov (!%p166_p9), 113   ;;  %s763_s14 = smov (!%p166_p9), 111   ;;  %v764_v12 = vmov (!%p166_p9), 1   ;;  %v890_v22 = vand.u32 (!%p166_p9), 127, %v197_v21 }
  0x12   : > { %v765_v29 = vmov (!%p166_p9), 839922192   ;;  %v913_v38 = vshrl.u32 (!%p166_p9), %v197_v21, 7  ;;  %v457_v33 = vld [vmem:[%s1071_s2] sm:$0xff] (!%p166_p9)  ;;  %s188_s28 = sand.u32 (!%p166_p9), 1, %s745_s16   ;;  %s768_s11 = smov (!%p166_p9), [#allocation2]  }
  0x13   : > { %314 = vperm.xlu1 (!%p166_p9), %682, %v617_v3   ;;  %251 = vperm.xlu0 (!%p166_p9), %681, %v614_v4   ;;  %v893_v25 = vadd.s32 (!%p166_p9), 128, %v890_v22  ;;  %v200_v26 = vand.u32 (!%p166_p9), 15, %v890_v22  ;;  %v317_v30 = vunpack.c.l.s4 (!%p166_p9), %v765_v29  ;;  %vm238_vm0 = vcmp.lt.s32.totalorder (!%p166_p9), %v890_v22, 16  ;;  %s611_s29 = sshll.u32 (!%p166_p9), %s188_s28, 4 }
  0x14   : > { %vm212_vm1 = vcmp.ge.s32.totalorder (!%p166_p9), %v890_v22, 16  ;;  %vm209_vm3 = vcmp.lt.s32.totalorder (!%p166_p9), %v890_v22, 17  ;;  %vm262_vm4 = vcmp.lt.s32.totalorder (!%p166_p9), %v890_v22, 15  ;;  %vm290_vm7 = vcmp.lt.s32.totalorder (!%p166_p9), %v890_v22, 1 }
  0x15   : > { %s192_s5 = scalar_select %p191_p10, %s815_s19, 1  ;;  %v201_v31 = vand.u32 15, %v893_v25  ;;  %vm901_vm2 = vcmp.ge.s32.totalorder %v200_v26, 1  ;;  %vm907_vm5 = vcmp.lt.s32.totalorder %v200_v26, 15  ;;  %v318_v37 = vunpack.c.0.s8 %v317_v30 }
  0x16   : > { %vm919_vm6 = vmand %vm212_vm1, %vm901_vm2  ;;  %vm334_vm11 = vcmp.lt.s32.totalorder %v890_v22, 127  ;;  %vm362_vm12 = vcmp.lt.s32.totalorder %v893_v25, 240  ;;  %vm358_vm13 = vcmp.lt.s32.totalorder %v890_v22, 113  ;;  %vm386_vm15 = vcmp.lt.s32.totalorder %v890_v22, 112 }
  0x17   : > { %s627_s10 = sshll.u32 %s192_s5, 3  ;;  %303 = vperm.xlu0 %681, %v616_v5   ;;  %vm924_vm8 = vcmp.ge.s32.totalorder %v201_v31, 1  ;;  %vm932_vm9 = vmand %vm212_vm1, %vm907_vm5  ;;  %vm940_vm10 = vcmp.lt.s32.totalorder %v201_v31, 15  ;;  %v321_v52 = vsub.s32 %v318_v37, %v913_v38  ;;  %s190_s5 = scalar_lea.vmem [#allocation2], %s611_s29 }
  0x18   : > { %s195_s13 = scalar_lea.vmem %s1069_s0, %s627_s10  ;;  %vm982_vm14 = vmand %vm362_vm12, %vm924_vm8  ;;  %s548_s6 = sshll.u32 %s190_s5, 4  ;;  %s1027_s6 = int_to_ptr.vmem [resolvable:$true] %s548_s6 }
  0x19   : > { %v864_v6 = vld [vmem:[%s195_s13] sm:$0xff]  ;;  %s762_s13 = smov 112   ;;  %s691_s10 = scalar_lea.vmem %s1027_s6, 256 }
  0x1a   : > { %205 = vrot.lane.b32.xlu1 %v864_v6, %s756_s22  ;;  %v203_v7 = vcombine.high %v864_v6, %v864_v6  ;;  %p692_p11 = scmp.ne.s32.totalorder %s1027_s6, %s691_s10 }
  0x1c   : > { %207 = vrot.lane.b32.xlu0 %v203_v7, %s756_s22  ;;  %p693_p12 = pnand %p692_p11, %p832_p5 }
  0x1e   : > { %234 = vrot.lane.b32.xlu1 %v864_v6, %s757_s23  ;;  %p694_p13 = pneg %p693_p12 }
  0x20   : > { %236 = vrot.lane.b32.xlu0 %v203_v7, %s757_s23 }
  0x22   : > { %258 = vrot.lane.b32.xlu1 %v864_v6, %s758_s27 }
  0x24   : > { %260 = vrot.lane.b32.xlu0 %v203_v7, %s758_s27 }
  0x26   : > { %347 = vperm.xlu1 %682, %v618_v8  }
  0x28   : > { %286 = vrot.lane.b32.xlu0 %v864_v6, %s759_s30 }
  0x2a   : > { %288 = vrot.lane.b32.xlu1 %v203_v7, %s759_s30  ;;  %s628_s30 = sshll.u32 %s815_s19, 8  ;;  %s534_s19 = scalar_lea.sflag [#allocation3], %s188_s28 }
  0x2c   : > { %375 = vperm.xlu0 %681, %v619_v10  }
  0x2e   : > { %399 = vperm.xlu1 %682, %v620_v9  }
  0x30   : > { %330 = vrot.lane.b32.xlu0 %v864_v6, %s760_s9 }
  0x32   : > { %332 = vrot.lane.b32.xlu1 %v203_v7, %s760_s9  ;;  %s1025_s9 = scalar_lea.hbm %s1073_s4, %s628_s30 }
  0x33   : > { %683 = vset.pattern.permute.xlu1 %v764_v12 }
  0x34   : > { %425 = vperm.xlu0 %681, %v621_v11  }
  0x36   : > { %354 = vrot.lane.b32.xlu1 %v864_v6, %s761_s12 }
  0x38   : > { %356 = vrot.lane.b32.xlu0 %v203_v7, %s761_s12  ;;  %s695_s12 = sshll.u32 %s768_s11, 4  ;;  %s696_s12 = int_to_ptr.vmem [resolvable:$false] %s695_s12 }
  0x39   : > { %p698_p0 = scmp.lt.s32.totalorder %s1027_s6, %s696_s12 }
  0x3a   : > { %382 = vrot.lane.b32.xlu1 %v864_v6, %s762_s13 }
  0x3c   : > { %384 = vrot.lane.b32.xlu0 %v203_v7, %s762_s13  ;;  %s697_s13 = scalar_lea.vmem %s696_s12, 512 }
  0x3d   : > { %p699_p1 = scmp.lt.s32.totalorder %s697_s13, %s691_s10 }
  0x3e   : > { %406 = vrot.lane.b32.xlu1 %v864_v6, %s763_s14 }
  0x3f   : > { %p700_p2 = por %p699_p1, %p698_p0 }
  0x40   : > { %408 = vrot.lane.b32.xlu0 %v203_v7, %s763_s14 }
  0x41   : > { %p701_p3 = pnand %p700_p2, %p694_p13 }
  0x8e   : > { %v280_v13 = vpop.permute.xlu1 %279  ;;  %v228_v14 = vpop.permute.xlu0 %227 }
  0x92   : > { %v888_v15 = vpop.permute.xlu1 %314  ;;  %v252_v16 = vpop.permute.xlu0 %251 }
  0x93   : > { %v322_v3 = vrot.slane %v888_v15, %v321_v52 }
  0x96   : > { %v304_v17 = vpop.permute.xlu0 %303  ;;  %v206_v18 = vpop.permute.xlu1 %205 }
  0x9a   : > { %v235_v19 = vpop.permute.xlu1 %234  ;;  %v208_v20 = vpop.permute.xlu0 %207 }
  0x9b   : > { %v211_v41 = vsel %vm209_vm3, %v208_v20, %v206_v18  ;;  %v210_v44 = vsel %vm209_vm3, %v206_v18, %v208_v20  ;;  %v324_v20 = vmul.f32 %v322_v3, %v864_v6 }
  0x9c   : > { %v222_v53 = vsel %vm919_vm6, %v211_v41, 0.0  ;;  %v223_v56 = vsel %vm924_vm8, %v210_v44, 0.0 }
  0x9d   : > { %v230_v63 = vmul.f32 %v228_v14, %v222_v53  ;;  %v231_v4 = vmul.f32 %v228_v14, %v223_v56  ;;  %v326_v30 = vcombine.high %v324_v20, %v324_v20 }
  0x9e   : > { %v259_v23 = vpop.permute.xlu1 %258  ;;  %v237_v24 = vpop.permute.xlu0 %236 }
  0x9f   : > { %v240_v36 = vsel %vm238_vm0, %v237_v24, %v235_v19  ;;  %v239_v50 = vsel %vm238_vm0, %v235_v19, %v237_v24  ;;  %vm410_vm0 = vcmp.lt.s32.totalorder %v890_v22, 111 }
  0xa0   : > { %v245_v45 = vsel %vm212_vm1, %v240_v36, 0.0  ;;  %v255_v59 = vmul.f32 %v252_v16, %v239_v50  ;;  %vm414_vm1 = vmand %vm362_vm12, %vm940_vm10 }
  0xa1   : > { %v254_v57 = vmul.f32 %v252_v16, %v245_v45 }
  0xa2   : > { %v261_v28 = vpop.permute.xlu0 %260  ;;  %v257_v10 = vadd.f32 %v255_v59, %v231_v4  ;;  %v766_v4 = vmov 2  }
  0xa3   : > { %v264_v43 = vsel %vm262_vm4, %v261_v28, %v259_v23  ;;  %v263_v47 = vsel %vm262_vm4, %v259_v23, %v261_v28  ;;  %v256_v7 = vadd.f32 %v254_v57, %v230_v63 }
  0xa4   : > { %v273_v54 = vsel %vm932_vm9, %v264_v43, 0.0  ;;  %v274_v58 = vsel %vm940_vm10, %v263_v47, 0.0 }
  0xa5   : > { %v896_v27 = vpop.permute.xlu1 %347  ;;  %v282_v0 = vmul.f32 %v280_v13, %v273_v54  ;;  %v283_v5 = vmul.f32 %v280_v13, %v274_v58 }
  0xa6   : > { %v287_v35 = vpop.permute.xlu0 %286 }
  0xa7   : > { %v284_v18 = vadd.f32 %v282_v0, %v256_v7  ;;  %v285_v15 = vadd.f32 %v283_v5, %v257_v10  ;;  %v458_v5 = vld [vmem:[%s1072_s3] sm:$0xff]  ;;  %v767_v7 = vmov 3  }
  0xa9   : > { %v289_v34 = vpop.permute.xlu1 %288 }
  0xaa   : > { %v292_v51 = vsel %vm290_vm7, %v289_v34, %v287_v35  ;;  %v291_v55 = vsel %vm290_vm7, %v287_v35, %v289_v34 }
  0xab   : > { %v376_v49 = vpop.permute.xlu0 %375  ;;  %v297_v60 = vsel %vm901_vm2, %v292_v51, 0.0  ;;  %v298_v1 = vsel %vm924_vm8, %v291_v55, 0.0 }
  0xac   : > { %v306_v8 = vmul.f32 %v304_v17, %v297_v60  ;;  %v307_v11 = vmul.f32 %v304_v17, %v298_v1  ;;  %v478_v17 = vsub.s32 1, %v913_v38 }
  0xad   : > { %v946_v48 = vpop.permute.xlu1 %399 }
  0xae   : > { %v308_v14 = vadd.f32 %v306_v8, %v284_v18  ;;  %v309_v21 = vadd.f32 %v307_v11, %v285_v15 }
  0xaf   : > { %v331_v62 = vpop.permute.xlu0 %330 }
  0xb0   : > { %v328_v35 = vadd.f32 %v324_v20, %v308_v14  ;;  %v329_v39 = vadd.f32 %v326_v30, %v309_v21  ;;  %v461_v14 = vsub.s32 0, %v913_v38 }
  0xb1   : > { %v333_v61 = vpop.permute.xlu1 %332 }
  0xb2   : > { %v335_v9 = vsel %vm334_vm11, %v331_v62, %v333_v61  ;;  %v336_v19 = vsel %vm334_vm11, %v333_v61, %v331_v62 }
  0xb3   : > { %v426_v12 = vpop.permute.xlu0 %425  ;;  %v341_v13 = vsel %vm907_vm5, %v335_v9, 0.0  ;;  %v342_v23 = vsel %vm940_vm10, %v336_v19, 0.0 }
  0xb4   : > { %v350_v26 = vmul.f32 %v896_v27, %v341_v13  ;;  %v351_v36 = vmul.f32 %v896_v27, %v342_v23  ;;  %v494_v23 = vsub.s32 2, %v913_v38 }
  0xb5   : > { %v355_v16 = vpop.permute.xlu1 %354 }
  0xb6   : > { %v352_v41 = vadd.f32 %v350_v26, %v328_v35  ;;  %v353_v47 = vadd.f32 %v351_v36, %v329_v39 }
  0xb7   : > { %v357_v6 = vpop.permute.xlu0 %356 }
  0xb8   : > { %v359_v28 = vsel %vm358_vm13, %v355_v16, %v357_v6  ;;  %v360_v29 = vsel %vm358_vm13, %v357_v6, %v355_v16 }
  0xb9   : > { %v383_v24 = vpop.permute.xlu1 %382  ;;  %v369_v31 = vsel %vm901_vm2, %v359_v28, 0.0  ;;  %v370_v34 = vsel %vm982_vm14, %v360_v29, 0.0  ;;  %vm432_vm2 = vcmask 1043456  }
  0xba   : > { %v378_v37 = vmul.f32 %v376_v49, %v369_v31  ;;  %v379_v42 = vmul.f32 %v376_v49, %v370_v34 }
  0xbb   : > { %v385_v40 = vpop.permute.xlu0 %384 }
  0xbc   : > { %v387_v43 = vsel %vm386_vm15, %v383_v24, %v385_v40  ;;  %v388_v44 = vsel %vm386_vm15, %v385_v40, %v383_v24  ;;  %v380_v50 = vadd.f32 %v378_v37, %v352_v41  ;;  %v381_v49 = vadd.f32 %v379_v42, %v353_v47 }
  0xbd   : > { %v394_v45 = vsel %vm362_vm12, %v388_v44, 0.0  ;;  %v407_v32 = vpop.permute.xlu1 %406  ;;  %v402_v51 = vmul.f32 %v946_v48, %v387_v43 }
  0xbe   : > { %v403_v52 = vmul.f32 %v946_v48, %v394_v45 }
  0xbf   : > { %v409_v27 = vpop.permute.xlu0 %408  ;;  %v404_v22 = vadd.f32 %v402_v51, %v380_v50 }
  0xc0   : > { %v411_v53 = vsel %vm410_vm0, %v407_v32, %v409_v27  ;;  %v412_v54 = vsel %vm410_vm0, %v409_v27, %v407_v32  ;;  %v405_v57 = vadd.f32 %v403_v52, %v381_v49 }
  0xc1   : > { %v419_v55 = vsel %vm907_vm5, %v411_v53, 0.0  ;;  %v420_v56 = vsel %vm414_vm1, %v412_v54, 0.0 }
  0xc2   : > { %v428_v58 = vmul.f32 %v426_v12, %v419_v55  ;;  %v429_v59 = vmul.f32 %v426_v12, %v420_v56 }
  0xc4   : > { %v430_v60 = vadd.f32 %v428_v58, %v404_v22  ;;  %v431_v48 = vadd.f32 %v429_v59, %v405_v57 }
  0xc6   : > { %v433_v61 = vsel %vm432_vm2, %v430_v60, 0.0  ;;  %v434_v46 = vsel %vm432_vm2, %v431_v48, 0.0  ;;  %v440_v62 = vmul.f32 %v430_v60, %v430_v60  ;;  %v441_v25 = vmul.f32 %v431_v48, %v431_v48 }
  0xc7   : > { %v435_v63 = vadd.f32 %v434_v46, %v433_v61 }
  0xc8   : > { %v442_v0 = vsel %vm432_vm2, %v440_v62, 0.0  ;;  %v443_v1 = vsel %vm432_vm2, %v441_v25, 0.0 }
  0xc9   : > { %436 = vadd.xlane.f32.xlu1 %v435_v63  ;;  %v444_v3 = vadd.f32 %v443_v1, %v442_v0 }
  0xcb   : > { %445 = vadd.xlane.f32.xlu0 %v444_v3 }
  0xda   : > { %485 = vperm.xlu1 %683, %v457_v33  }
  0xde   : > { %684 = vset.pattern.permute.xlu1 %v766_v4 }
  0xdf   : > { %501 = vperm.xlu1 %684, %v457_v33  }
  0xe1   : > { %469 = vperm.xlu0 %681, %v457_v33  }
  0xe3   : > { %686 = vset.pattern.permute.xlu1 %v755_v2 }
  0xe4   : > { %526 = vperm.xlu1 %686, %v458_v5  }
  0xe5   : > { %685 = vset.pattern.permute.xlu0 %v767_v7 }
  0xe6   : > { %517 = vperm.xlu0 %685, %v457_v33  }
  0xea   : > { %687 = vset.pattern.permute.xlu0 %v755_v2  ;;  %v510_v2 = vsub.s32 3, %v913_v38 }
 0x156   : > { %v437_v8 = vpop.xlane.xlu1 %436 }
 0x157   : > { %v439_v9 = vmul.f32 0.00390625, %v437_v8 }
 0x158   : > { %v446_v10 = vpop.xlane.xlu0 %445 }
 0x159   : > { %v447_v11 = vmul.f32 0.00390625, %v446_v10  ;;  %v448_v12 = vmul.f32 %v439_v9, %v439_v9  ;;  %v451_v15 = vsub.f32 %v430_v60, %v439_v9  ;;  %v452_v13 = vsub.f32 %v431_v48, %v439_v9 }
 0x15a   : > { %v486_v20 = vpop.permute.xlu1 %485 }
 0x15b   : > { %v449_v16 = vsub.f32 %v447_v11, %v448_v12 }
 0x15d   : > { %v450_v18 = vmax.f32 %v449_v16, 0.0 }
 0x15e   : > { %v502_v39 = vpop.permute.xlu1 %501 }
 0x15f   : > { %v453_v19 = vadd.f32 1e-05, %v450_v18 }
 0x160   : > { %v470_v26 = vpop.permute.xlu0 %469 }
 0x161   : > { %689 = vrsqrt.f32 %v453_v19 }
 0x163   : > { %v527_v49 = vpop.permute.xlu1 %526 }
 0x165   : > { %v518_v43 = vpop.permute.xlu0 %517 }
 0x16b   : > { %v690_v21 = vpop.eup %689 }
 0x16c   : > { %v455_v6 = vmul.f32 %v690_v21, %v451_v15  ;;  %v456_v24 = vmul.f32 %v690_v21, %v452_v13 }
 0x16e   : > { %v462_v28 = vrot.slane %v455_v6, %v461_v14  ;;  %v466_v29 = vrot.slane %v456_v24, %v461_v14  ;;  %v479_v30 = vrot.slane %v455_v6, %v478_v17  ;;  %v483_v31 = vrot.slane %v456_v24, %v478_v17 }
 0x16f   : > { %v511_v34 = vrot.slane %v455_v6, %v510_v2  ;;  %v515_v35 = vrot.slane %v456_v24, %v510_v2  ;;  %v495_v36 = vrot.slane %v455_v6, %v494_v23  ;;  %v499_v37 = vrot.slane %v456_v24, %v494_v23 }
 0x170   : > { %v472_v40 = vmul.f32 %v470_v26, %v462_v28  ;;  %v473_v41 = vmul.f32 %v470_v26, %v466_v29  ;;  %v488_v42 = vmul.f32 %v486_v20, %v479_v30  ;;  %v489_v38 = vmul.f32 %v486_v20, %v483_v31 }
 0x171   : > { %v504_v32 = vmul.f32 %v502_v39, %v495_v36  ;;  %v505_v47 = vmul.f32 %v502_v39, %v499_v37  ;;  %v520_v50 = vmul.f32 %v518_v43, %v511_v34  ;;  %v521_v51 = vmul.f32 %v518_v43, %v515_v35 }
 0x172   : > { %v490_v44 = vadd.f32 %v488_v42, %v472_v40  ;;  %v491_v45 = vadd.f32 %v489_v38, %v473_v41 }
 0x174   : > { %v506_v52 = vadd.f32 %v504_v32, %v490_v44  ;;  %v507_v27 = vadd.f32 %v505_v47, %v491_v45 }
 0x176   : > { %v522_v53 = vadd.f32 %v520_v50, %v506_v52  ;;  %v523_v54 = vadd.f32 %v521_v51, %v507_v27 }
 0x178   : > { %v529_v55 = vadd.f32 %v527_v49, %v522_v53  ;;  %v530_v56 = vadd.f32 %v527_v49, %v523_v54 }
 0x17a   : > { %531 = vst [vmem:[%s190_s5] sm:$0xff] %v529_v55  ;;  %532 = vst [vmem:[%s190_s5 + $0x8] sm:$0xff] %v530_v56 }
 0x17b   : > { %704 = shalt.err (!%p701_p3)
}
 0x17c   : > { %s705_s14 = scalar_lea.hbm %s1025_s9, 256  ;;  %s709_s23 = scalar_lea.hbm %s1073_s4, 512 }
 0x17d   : > { %p706_p4 = scmp.ne.s32.totalorder %s1025_s9, %s705_s14  ;;  %p710_p9 = scmp.lt.u32.totalorder %s1025_s9, %s1073_s4 }
 0x17e   : > { %p711_p10 = scmp.lt.u32.totalorder %s709_s23, %s705_s14  ;;  %p713_p12 = scmp.lt.u32.totalorder %s705_s14, %s1025_s9 }
 0x17f   : > { %p707_p7 = pnand %p706_p4, %p832_p5 }
 0x180   : > { %p712_p11 = por %p711_p10, %p710_p9 }
 0x181   : > { %p708_p8 = pneg %p707_p7 }
 0x182   : > { %p714_p13 = por %p713_p12, %p712_p11 }
 0x184   : > { %p715_p0 = pnand %p714_p13, %p708_p8 }
 0x186   : > { %718 = shalt.err (!%p715_p0)
}
 0x187   : > { %629 = dma.vmem_to_hbm [thread:$0]  (%p832_p5), %s1027_s6, 256, %s1025_s9, %s534_s19  }
 0x188 PF: > { %p635_p1 = scmp.ge.s32.totalorder %s753_s18, 2  ;;  %s560_s29 = sand.u32 1, %s741_s15  }
 0x189   : > { %s561_s30 = scalar_lea.sflag [#allocation3], %s560_s29 }
 0x18a   : > { %p632_p2 = pnand %p635_p1, %p836_p6 }
 0x18c   : > { %736 = dma.done.wait (!%p632_p2), %s561_s30, 256  }
 0x18d   : > { %738 = vsyncadd (!%p632_p2), %s561_s30, 4294967040  ;;  %p14_p3 = scmp.ge.s32.totalorder %s819_s21, 4   ;;  %s1090_s15 = smov %s745_s16 }
 0x18e   : > { %s1091_s16 = smov %s749_s17  ;;  %s1092_s17 = smov %s830_s24 }
 0x18f   : > { %s1093_s18 = smov %s819_s21  ;;  %16 = sbr.rel (!%p14_p3) target bundleno = 3 (0x3), region = 79 }
 0x196   :  { %566 = vsyncpa [#allocation3], 1 }
 0x197   :  { %568 = vsyncpa [#allocation3 + $0x1], 1 }

</bundles_post_ra>
